<compile_context>
chip_gen: v5e
topology: v5e:2x2
jax: 0.10.0
libtpu: 0.0.40
codegen_flags: <defaults>
</compile_context>

<pallas_src>
import jax
import jax.numpy as jnp
from jax.experimental import pallas as pl
from jax.experimental.pallas import tpu as pltpu

LANE = 128


def _round_up(x, m):
    return ((x + m - 1) // m) * m


def _pad2d(a, rows, cols):
    r, c = a.shape
    if r == rows and c == cols:
        return a
    return jnp.pad(a, ((0, rows - r), (0, cols - c)))


def _pick_tile_b(B, sub, cap=1024, min_steps=2):
    """Batch-tile rows: as large as possible (amortize ~0.35us per grid step),
    capped, a multiple of the sublane count, never larger than the batch, and
    small enough that the grid has >= min_steps steps (v7x: 2 TensorCores)."""
    if B <= sub:
        return B                              # full-array block: legal for any B
    tile = min(cap, B)
    tile = max(sub, (tile // sub) * sub)      # multiple of sublane count, <= B
    if -(-B // tile) < min_steps and B >= min_steps * sub:
        tile2 = _round_up(-(-B // min_steps), sub)
        tile = max(sub, min(tile2, (B // sub) * sub))
    return tile


def _make_mlp_kernel(num_linear, compute_dtype):
    """Fused kernel: num_linear x (matmul + bias), ReLU between layers."""

    def kernel(*refs):
        x_ref = refs[0]
        o_ref = refs[-1]
        wb = refs[1:-1]                       # (w0, b0, w1, b1, ...)

        h = x_ref[...]                        # f32 activations
        for li in range(num_linear):
            w = wb[2 * li][...]               # already in compute dtype (prep-time cast)
            b = wb[2 * li + 1][...]           # f32
            h = jnp.dot(h.astype(compute_dtype), w,
                        preferred_element_type=jnp.float32) + b
            if li < num_linear - 1:
                h = jnp.maximum(h, 0.0)
        o_ref[...] = h.astype(o_ref.dtype)

    return kernel


def prepare_params(params, *, use_bf16_matmul=False):
    """One-time parameter prep (hoisted out of the per-call path).

    params: list of (w, b) with w: [in_dim, out_dim] (transpose of
            nn.Linear.weight), b: [1, out_dim].
    Zero-pads hidden/output feature dims to multiples of 128 (exact: padded
    columns/rows contribute exactly 0), keeps the first layer's K dim equal to
    the raw n_in, and casts weights to the matmul compute dtype. Biases stay
    f32 (they are added after the f32 accumulation).
    """
    compute_dtype = jnp.bfloat16 if use_bf16_matmul else jnp.float32
    prepared = []
    for i, (w, b) in enumerate(params):
        k, n = w.shape
        kp = k if i == 0 else _round_up(k, LANE)   # first-layer K matches raw x
        np_ = _round_up(n, LANE)
        w_p = _pad2d(w, kp, np_).astype(compute_dtype)
        b_p = _pad2d(b.reshape(1, -1), 1, np_).astype(jnp.float32)
        prepared.append((w_p, b_p))
    return {
        "params": prepared,
        "compute_dtype": compute_dtype,
        "n_in": params[0][0].shape[0],
        "n_out": params[-1][0].shape[1],
    }


def mlp_forward(x, prep, *, tile_b=None, return_padded=False):
    """Fused MLP forward.

    x:    [B, n_inputs] float32
    prep: output of prepare_params().
    """
    B, n_in = x.shape
    params = prep["params"]
    compute_dtype = prep["compute_dtype"]
    n_out = prep["n_out"]
    assert n_in == prep["n_in"], "x feature dim does not match prepared params"

    num_linear = len(params)
    out_pad = params[-1][0].shape[1]

    # Dtype-aware sublane count (f32 -> 8, bf16 -> 16, int8/fp8 -> 32).
    sub = max(8, 32 // x.dtype.itemsize)
    cap = 1024 if tile_b is None else max(1, int(tile_b))
    tile_b = _pick_tile_b(B, sub, cap=cap)

    grid = (pl.cdiv(B, tile_b),)

    # Weights/biases: constant index_map -> fetched once, never re-DMA'd.
    # Single-buffer them when large so a dead second buffer doesn't eat VMEM
    # (matters most on v7x's 64 MiB).
    wb_bytes = sum(int(w.nbytes) + int(b.nbytes) for (w, b) in params)
    single_buffer_wb = wb_bytes > (8 << 20)

    wb_specs, flat_wb = [], []
    for (w, b) in params:
        if single_buffer_wb:
            wb_specs.append(pl.BlockSpec(w.shape, lambda i: (0, 0),
                                         pipeline_mode=pl.Buffered(1)))
            wb_specs.append(pl.BlockSpec(b.shape, lambda i: (0, 0),
                                         pipeline_mode=pl.Buffered(1)))
        else:
            wb_specs.append(pl.BlockSpec(w.shape, lambda i: (0, 0)))
            wb_specs.append(pl.BlockSpec(b.shape, lambda i: (0, 0)))
        flat_wb.extend([w, b])

    # VMEM budget from actual sizes: double-buffered x/out tiles, weights x1
    # or x2, plus headroom for f32 intermediates.
    max_feat = max(w.shape[1] for (w, _) in params)
    vmem_bytes = (2 * tile_b * n_in * x.dtype.itemsize
                  + 2 * tile_b * out_pad * x.dtype.itemsize
                  + wb_bytes * (1 if single_buffer_wb else 2)
                  + 4 * tile_b * max_feat * 4)
    vmem_limit = int(min(128 << 20, max(16 << 20, vmem_bytes + (4 << 20))))

    flops = int(2 * B * sum(w.shape[0] * w.shape[1] for (w, _) in params))
    bytes_accessed = int(x.nbytes + wb_bytes + B * out_pad * x.dtype.itemsize)

    kernel = _make_mlp_kernel(num_linear, compute_dtype)

    out = pl.pallas_call(
        kernel,
        out_shape=jax.ShapeDtypeStruct((B, out_pad), x.dtype),
        grid_spec=pltpu.PrefetchScalarGridSpec(
            num_scalar_prefetch=0,
            grid=grid,
            in_specs=[pl.BlockSpec((tile_b, n_in), lambda i: (i, 0))] + wb_specs,
            out_specs=pl.BlockSpec((tile_b, out_pad), lambda i: (i, 0)),
        ),
        compiler_params=pltpu.CompilerParams(
            dimension_semantics=("parallel",),
            vmem_limit_bytes=vmem_limit,
        ),
        cost_estimate=pl.CostEstimate(flops=flops, transcendentals=0,
                                      bytes_accessed=bytes_accessed),
    )(x, *flat_wb)

    if return_padded:
        return out                 # [B, out_pad]; valid columns are [:, :n_out]
    return out[:, :n_out]


def init_params(key, n_inputs, n_outputs, n_layers=1, n_units=100):
    """PyTorch nn.Linear-style init: U(-1/sqrt(fan_in), 1/sqrt(fan_in))."""
    dims = [n_inputs] + [n_units] * (n_layers + 1) + [n_outputs]
    params = []
    for fan_in, fan_out in zip(dims[:-1], dims[1:]):
        key, kw, kb = jax.random.split(key, 3)
        bound = 1.0 / (fan_in ** 0.5)
        w = jax.random.uniform(kw, (fan_in, fan_out), jnp.float32, -bound, bound)
        b = jax.random.uniform(kb, (1, fan_out), jnp.float32, -bound, bound)
        params.append((w, b))
    return params


def mlp_reference(x, params):
    h = x
    for i, (w, b) in enumerate(params):
        h = h @ w + b
        if i < len(params) - 1:
            h = jnp.maximum(h, 0.0)
    return h


if __name__ == "__main__":
    # Small shapes consistent with the module:
    # MLP(n_inputs=4, n_outputs=4, n_layers=1, n_units=32), batch=16.
    n_inputs, n_outputs, n_layers, n_units = 4, 4, 1, 32
    batch = 16

    key = jax.random.PRNGKey(0)
    kx, kp = jax.random.split(key)
    x = jax.random.normal(kx, (batch, n_inputs), dtype=jnp.float32)
    params = init_params(kp, n_inputs, n_outputs, n_layers, n_units)

    ref = mlp_reference(x, params)

    # f32 path (matches reference to tight tolerance).
    prep_f32 = prepare_params(params, use_bf16_matmul=False)
    out = jax.block_until_ready(mlp_forward(x, prep_f32))
    assert out.shape == (batch, n_outputs)
    assert jnp.allclose(out, ref, atol=1e-5, rtol=1e-5)

    # bf16-matmul MXU fast path (valid on v5e/v6e/v7x), f32 accumulation.
    prep_bf16 = prepare_params(params, use_bf16_matmul=True)
    out_bf16 = jax.block_until_ready(mlp_forward(x, prep_bf16))
    assert out_bf16.shape == (batch, n_outputs)
    assert jnp.allclose(out_bf16, ref, atol=5e-2, rtol=5e-2)

    # Padded-output fast path: skip the per-call column strip downstream.
    out_padded = jax.block_until_ready(mlp_forward(x, prep_f32, return_padded=True))
    assert out_padded.shape[0] == batch and out_padded.shape[1] % 128 == 0
    assert jnp.allclose(out_padded[:, :n_outputs], ref, atol=1e-5, rtol=1e-5)

    print("KERNEL_OK")
</pallas_src>

<mosaic_0001>
module attributes {stable_mosaic.version = 11 : i64} {
  func.func @kernel(%arg0: i32, %arg1: memref<8x4xf32, #tpu.memory_space<vmem>>, %arg2: memref<4x128xf32, #tpu.memory_space<vmem>>, %arg3: memref<1x128xf32, #tpu.memory_space<vmem>>, %arg4: memref<128x128xf32, #tpu.memory_space<vmem>>, %arg5: memref<1x128xf32, #tpu.memory_space<vmem>>, %arg6: memref<128x128xf32, #tpu.memory_space<vmem>>, %arg7: memref<1x128xf32, #tpu.memory_space<vmem>>, %arg8: memref<8x128xf32, #tpu.memory_space<vmem>>) attributes {dimension_semantics = [#tpu.dimension_semantics<parallel>], iteration_bounds = array<i64: 2>, scalar_prefetch = 0 : i64, scratch_operands = 0 : i64, tpu.core_type = #tpu.core_type<tc>, window_params = [{transform_indices = @transform_0, window_bounds = array<i64: 8, 4>}, {pipeline_mode = #tpu.pipeline_mode<synchronous>, transform_indices = @transform_1, window_bounds = array<i64: 4, 128>}, {pipeline_mode = #tpu.pipeline_mode<synchronous>, transform_indices = @transform_2, window_bounds = array<i64: 1, 128>}, {pipeline_mode = #tpu.pipeline_mode<synchronous>, transform_indices = @transform_3, window_bounds = array<i64: 128, 128>}, {pipeline_mode = #tpu.pipeline_mode<synchronous>, transform_indices = @transform_4, window_bounds = array<i64: 1, 128>}, {pipeline_mode = #tpu.pipeline_mode<synchronous>, transform_indices = @transform_5, window_bounds = array<i64: 128, 128>}, {pipeline_mode = #tpu.pipeline_mode<synchronous>, transform_indices = @transform_6, window_bounds = array<i64: 1, 128>}, {transform_indices = @transform_7, window_bounds = array<i64: 8, 128>}]} {
    %c0 = arith.constant 0 : index
    %c0_0 = arith.constant 0 : index
    %0 = vector.load %arg1[%c0, %c0_0] : memref<8x4xf32, #tpu.memory_space<vmem>>, vector<8x4xf32>
    %c0_1 = arith.constant 0 : index
    %c0_2 = arith.constant 0 : index
    %1 = vector.load %arg2[%c0_1, %c0_2] : memref<4x128xf32, #tpu.memory_space<vmem>>, vector<4x128xf32>
    %c0_3 = arith.constant 0 : index
    %c0_4 = arith.constant 0 : index
    %2 = vector.load %arg3[%c0_3, %c0_4] : memref<1x128xf32, #tpu.memory_space<vmem>>, vector<1x128xf32>
    %cst = arith.constant dense<0.000000e+00> : vector<8x128xf32>
    %3 = tpu.matmul %0, %1, %cst {dimension_numbers = #tpu.dot_dimension_numbers<[1], [0], [0], [1], [0, 0, 1, 1], [], []>} : vector<8x4xf32>, vector<4x128xf32>, vector<8x128xf32> -> vector<8x128xf32>
    %4 = vector.broadcast %2 : vector<1x128xf32> to vector<8x128xf32>
    %5 = arith.addf %3, %4 : vector<8x128xf32>
    %cst_5 = arith.constant 0.000000e+00 : f32
    %6 = vector.broadcast %cst_5 : f32 to vector<8x128xf32>
    %7 = arith.maximumf %5, %6 : vector<8x128xf32>
    %c0_6 = arith.constant 0 : index
    %c0_7 = arith.constant 0 : index
    %8 = vector.load %arg4[%c0_6, %c0_7] : memref<128x128xf32, #tpu.memory_space<vmem>>, vector<128x128xf32>
    %c0_8 = arith.constant 0 : index
    %c0_9 = arith.constant 0 : index
    %9 = vector.load %arg5[%c0_8, %c0_9] : memref<1x128xf32, #tpu.memory_space<vmem>>, vector<1x128xf32>
    %cst_10 = arith.constant dense<0.000000e+00> : vector<8x128xf32>
    %10 = tpu.matmul %7, %8, %cst_10 {dimension_numbers = #tpu.dot_dimension_numbers<[1], [0], [0], [1], [0, 0, 1, 1], [], []>} : vector<8x128xf32>, vector<128x128xf32>, vector<8x128xf32> -> vector<8x128xf32>
    %11 = vector.broadcast %9 : vector<1x128xf32> to vector<8x128xf32>
    %12 = arith.addf %10, %11 : vector<8x128xf32>
    %cst_11 = arith.constant 0.000000e+00 : f32
    %13 = vector.broadcast %cst_11 : f32 to vector<8x128xf32>
    %14 = arith.maximumf %12, %13 : vector<8x128xf32>
    %c0_12 = arith.constant 0 : index
    %c0_13 = arith.constant 0 : index
    %15 = vector.load %arg6[%c0_12, %c0_13] : memref<128x128xf32, #tpu.memory_space<vmem>>, vector<128x128xf32>
    %c0_14 = arith.constant 0 : index
    %c0_15 = arith.constant 0 : index
    %16 = vector.load %arg7[%c0_14, %c0_15] : memref<1x128xf32, #tpu.memory_space<vmem>>, vector<1x128xf32>
    %cst_16 = arith.constant dense<0.000000e+00> : vector<8x128xf32>
    %17 = tpu.matmul %14, %15, %cst_16 {dimension_numbers = #tpu.dot_dimension_numbers<[1], [0], [0], [1], [0, 0, 1, 1], [], []>} : vector<8x128xf32>, vector<128x128xf32>, vector<8x128xf32> -> vector<8x128xf32>
    %18 = vector.broadcast %16 : vector<1x128xf32> to vector<8x128xf32>
    %19 = arith.addf %17, %18 : vector<8x128xf32>
    %c0_17 = arith.constant 0 : index
    %c0_18 = arith.constant 0 : index
    %20 = vector.load %arg8[%c0_17, %c0_18] : memref<8x128xf32, #tpu.memory_space<vmem>>, vector<8x128xf32>
    tpu.vector_store %arg8[%c0_17, %c0_18], %19 {strides = array<i32>} : memref<8x128xf32, #tpu.memory_space<vmem>>, vector<8x128xf32>,
    return
  }
  func.func @transform_0(%arg0: i32) -> (i32, i32) {
    %c0_i32 = arith.constant 0 : i32
    %c0_i32_0 = arith.constant 0 : i32
    return %arg0, %c0_i32 : i32, i32
  }
  func.func @transform_1(%arg0: i32) -> (i32, i32) {
    %c0_i32 = arith.constant 0 : i32
    %c0_i32_0 = arith.constant 0 : i32
    %c0_i32_1 = arith.constant 0 : i32
    return %c0_i32, %c0_i32_0 : i32, i32
  }
  func.func @transform_2(%arg0: i32) -> (i32, i32) {
    %c0_i32 = arith.constant 0 : i32
    %c0_i32_0 = arith.constant 0 : i32
    %c0_i32_1 = arith.constant 0 : i32
    return %c0_i32, %c0_i32_0 : i32, i32
  }
  func.func @transform_3(%arg0: i32) -> (i32, i32) {
    %c0_i32 = arith.constant 0 : i32
    %c0_i32_0 = arith.constant 0 : i32
    %c0_i32_1 = arith.constant 0 : i32
    return %c0_i32, %c0_i32_0 : i32, i32
  }
  func.func @transform_4(%arg0: i32) -> (i32, i32) {
    %c0_i32 = arith.constant 0 : i32
    %c0_i32_0 = arith.constant 0 : i32
    %c0_i32_1 = arith.constant 0 : i32
    return %c0_i32, %c0_i32_0 : i32, i32
  }
  func.func @transform_5(%arg0: i32) -> (i32, i32) {
    %c0_i32 = arith.constant 0 : i32
    %c0_i32_0 = arith.constant 0 : i32
    %c0_i32_1 = arith.constant 0 : i32
    return %c0_i32, %c0_i32_0 : i32, i32
  }
  func.func @transform_6(%arg0: i32) -> (i32, i32) {
    %c0_i32 = arith.constant 0 : i32
    %c0_i32_0 = arith.constant 0 : i32
    %c0_i32_1 = arith.constant 0 : i32
    return %c0_i32, %c0_i32_0 : i32, i32
  }
  func.func @transform_7(%arg0: i32) -> (i32, i32) {
    %c0_i32 = arith.constant 0 : i32
    %c0_i32_0 = arith.constant 0 : i32
    return %arg0, %c0_i32 : i32, i32
  }
}

</mosaic_0001>

<bundles_post_ra>
// kernel: tpu_custom_call.1
= control target key start
LH: loop header
LB: loop body
LE: loop exit
PB: predicated region body
PF: predicated region fallthrough
CT: control target
= control target key end

     0   :  { %12 = vsyncpa [#allocation3], 0  ;;  %s901_s0 = inlined_call_operand.vmem [shape: f32[16,4], index: 0, kind: input, shape index: {}]   ;;  %s902_s1 = inlined_call_operand.vmem [shape: f32[4,128], index: 1, kind: input, shape index: {}]   ;;  %s903_s2 = inlined_call_operand.vmem [shape: f32[1,128], index: 2, kind: input, shape index: {}]   ;;  %s904_s3 = inlined_call_operand.hbm [shape: f32[128,128], index: 3, kind: input, shape index: {}]   ;;  %s905_s4 = inlined_call_operand.vmem [shape: f32[1,128], index: 4, kind: input, shape index: {}]   ;;  %s906_s5 = inlined_call_operand.hbm [shape: f32[128,128], index: 5, kind: input, shape index: {}]   ;;  %s907_s6 = inlined_call_operand.vmem [shape: f32[1,128], index: 6, kind: input, shape index: {}]   ;;  %s908_s7 = inlined_call_operand.hbm [shape: f32[16,128], index: 7, kind: output, shape index: {}]  }
   0x1   :  { %13 = vsyncpa [#allocation6], 0 }
   0x2   :  { %14 = vsyncpa [#allocation4], 0 }
   0x3   :  { %16 = vsyncpa [#allocation4 + $0x1], 0  ;;  %s779_s24 = smov 0   ;;  %s781_s25 = smov 0  }
   0x4   :  { %s783_s26 = smov 0   ;;  %s785_s27 = smov 0  }
   0x5 LB: > { %s800_s28 = sadd.s32 4294967295, %s733_s27   ;;  %s522_s29 = sadd.s32 4294967294, %s733_s27   ;;  %s733_s27 = sphi %s785_s27, %s915_s27   ;;  %s729_s26 = sphi %s783_s26, %s914_s26   ;;  %s725_s25 = sphi %s781_s25, %s913_s25   ;;  %s721_s24 = sphi %s779_s24, %s912_s24  }
   0x6   : > { %s804_s30 = sadd.s32 1, %s733_s27   ;;  %s181_s8 = sadd.s32 1, %s729_s26 }
   0x7   : > { %s178_s9 = ssub.s32 %s733_s27, %s804_s30  ;;  %p191_p0 = scmp.ne.s32.totalorder %s729_s26, %s725_s25 }
   0x8   : > { %p179_p1 = scmp.eq.s32.totalorder %s178_s9, 0  ;;  %p192_p2 = scmp.eq.s32.totalorder %s800_s28, 1 }
   0x9   : > { %p197_p3 = scmp.ne.s32.totalorder %s725_s25, %s721_s24  ;;  %p198_p4 = scmp.eq.s32.totalorder %s522_s29, 1 }
   0xa   : > { %s815_s10 = scalar_select %p179_p1, %s729_s26, %s181_s8  }
   0xb   : > { %p817_p5 = por %p192_p2, %p191_p0  ;;  %p821_p6 = por %p198_p4, %p197_p3 }
   0xc   : > { %p523_p7 = scmp.ge.s32.totalorder %s733_s27, 1  ;;  %p205_p8 = scmp.lt.s32.totalorder %s733_s27, 3 }
   0xd   : > { %p559_p9 = scmp.eq.s32.totalorder %s800_s28, 0  ;;  %s222_s16 = sshll.u32 %s904_s3, 4  ;;  %s223_s16 = int_to_ptr.hbm [resolvable:$true] %s222_s16 }
   0xe   : > { %p828_p10 = pnand %p523_p7, %p205_p8  ;;  %s735_s17 = smov [#allocation2]  }
   0xf   : > { %s224_s18 = sshll.u32 %s735_s17, 4  ;;  %s239_s21 = sshll.u32 %s906_s5, 4  ;;  %s225_s18 = int_to_ptr.vmem [resolvable:$true] %s224_s18  ;;  %s240_s21 = int_to_ptr.hbm [resolvable:$true] %s239_s21 }
  0x10   : > { %p548_p11 = pneg %p828_p10  ;;  %s736_s22 = smov 128  }
  0x11   : > { %s737_s23 = smov 8   ;;  %s738_s29 = smov [#allocation5]  }
  0x12   : > { %p549_p12 = pnand %p559_p9, %p548_p11  ;;  %s241_s8 = sshll.u32 %s738_s29, 4  ;;  %s242_s8 = int_to_ptr.vmem [resolvable:$true] %s241_s8 }
  0x13   : > { %267 = sbr.rel (%p828_p10) target bundleno = 431 (0x1af), region = 48 }
  0x14   : > { %551 = dma.hbm_to_vmem [thread:$0]  (!%p549_p12), %s223_s16, 2048, %s225_s18, [#allocation3], %s736_s22, %s736_s22, %s737_s23  }
  0x15   : > { %554 = dma.hbm_to_vmem [thread:$0]  (!%p549_p12), %s240_s21, 2048, %s242_s8, [#allocation6], %s736_s22, %s736_s22, %s737_s23  }
  0x18   : > { %708 = dma.done.wait (%p559_p9), [#allocation3], 2048  }
  0x19   : > { %710 = vsyncadd (%p559_p9), [#allocation3], 4294965248 }
  0x1a   : > { %712 = dma.done.wait (%p559_p9), [#allocation6], 2048  }
  0x1b   : > { %714 = vsyncadd (%p559_p9), [#allocation6], 4294965248  ;;  %p304_p13 = scmp.lt.s32.totalorder %s800_s28, 1  ;;  %vm318_vm0 = vcmask 1043456   ;;  %vm314_vm1 = vcmask 31744   ;;  %v358_v2 = vld [vmem:[#allocation2 + $0x78] sm:$0xff] }
  0x1c   : > { %v309_v0 = vld [vmem:[%s902_s1] sm:$0xf]  ;;  %363 = vmatpush.msra.mxu1 %v358_v2  ;;  %v357_v3 = vld [vmem:[#allocation2 + $0x70] sm:$0xff]  ;;  %v356_v4 = vld [vmem:[#allocation2 + $0x68] sm:$0xff]  ;;  %s301_s23 = sand.u32 1, %s725_s25   ;;  %s535_s8 = sshll.u32 %s800_s28, 3 }
  0x1d   : > { %s305_s9 = scalar_select %p304_p13, %s800_s28, 1  ;;  %532 = vmatpush.msk.msra.mxu0 %vm318_vm0, %v309_v0  ;;  %v355_v5 = vld [vmem:[#allocation2 + $0x60] sm:$0xff]  ;;  %v354_v6 = vld [vmem:[#allocation2 + $0x58] sm:$0xff]  ;;  %v353_v7 = vld [vmem:[#allocation2 + $0x50] sm:$0xff] }
  0x1e   : > { %364 = vmatpush.msra.mxu1 %v357_v3  ;;  %v352_v8 = vld [vmem:[#allocation2 + $0x48] sm:$0xff]  ;;  %v351_v9 = vld [vmem:[#allocation2 + $0x40] sm:$0xff]  ;;  %v350_v10 = vld [vmem:[#allocation2 + $0x38] sm:$0xff]  ;;  %s530_s29 = sshll.u32 %s301_s23, 3  ;;  %s436_s13 = scalar_lea.hbm %s908_s7, %s535_s8 }
  0x1f   : > { %s531_s14 = sshll.u32 %s305_s9, 3  ;;  %v349_v11 = vld [vmem:[#allocation2 + $0x30] sm:$0xff]  ;;  %v348_v12 = vld [vmem:[#allocation2 + $0x28] sm:$0xff]  ;;  %v347_v13 = vld [vmem:[#allocation2 + $0x20] sm:$0xff]  ;;  %s303_s17 = scalar_lea.vmem [#allocation7], %s530_s29 }
  0x20   : > { %s307_s16 = scalar_lea.vmem %s901_s0, %s531_s14  ;;  %365 = vmatpush.msra.mxu1 %v356_v4  ;;  %v346_v14 = vld [vmem:[#allocation2 + $0x18] sm:$0xff]  ;;  %v345_v15 = vld [vmem:[#allocation2 + $0x10] sm:$0xff]  ;;  %v344_v16 = vld [vmem:[#allocation2 + $0x8] sm:$0xff]  ;;  %s438_s18 = sshll.u32 %s303_s17, 4  ;;  %s439_s18 = int_to_ptr.vmem [resolvable:$true] %s438_s18 }
  0x21   : > { %v308_v1 = vld [vmem:[%s307_s16] sm:$0xff]  ;;  %v399_v18 = vld [vmem:[#allocation5 + $0x78] sm:$0xff]  ;;  %v398_v19 = vld [vmem:[#allocation5 + $0x70] sm:$0xff]  ;;  %s440_s19 = sshll.u32 %s436_s13, 4  ;;  %s426_s20 = scalar_lea.sflag [#allocation4], %s301_s23  ;;  %s441_s19 = int_to_ptr.hbm [resolvable:$true] %s440_s19 }
  0x22   : > { %533 = vmatmul.msk.f32.vlgmr.msra.gmra.mxu0 %vm314_vm1, %v308_v1  ;;  %366 = vmatpush.msra.mxu1 %v355_v5  ;;  %v343_v17 = vld [vmem:[#allocation2] sm:$0xff]  ;;  %v397_v20 = vld [vmem:[#allocation5 + $0x68] sm:$0xff]  ;;  %v395_v22 = vld [vmem:[#allocation5 + $0x58] sm:$0xff]  ;;  %s677_s21 = sshra.s32 %s441_s19, 4  ;;  %s683_s9 = scalar_lea.hbm %s908_s7, 16  ;;  %s678_s21 = int_to_ptr.hbm [resolvable:$true] %s677_s21 }
  0x23   : > { %404 = vmatpush.msra.mxu2 %v399_v18  ;;  %v396_v21 = vld [vmem:[#allocation5 + $0x60] sm:$0xff]  ;;  %v394_v23 = vld [vmem:[#allocation5 + $0x50] sm:$0xff]  ;;  %v393_v24 = vld [vmem:[#allocation5 + $0x48] sm:$0xff]  ;;  %s679_s28 = scalar_lea.hbm %s678_s21, 8  ;;  %p684_p3 = scmp.lt.s32.totalorder %s678_s21, %s908_s7 }
  0x24   : > { %367 = vmatpush.msra.mxu1 %v354_v6  ;;  %v392_v25 = vld [vmem:[#allocation5 + $0x40] sm:$0xff]  ;;  %v391_v26 = vld [vmem:[#allocation5 + $0x38] sm:$0xff]  ;;  %v390_v27 = vld [vmem:[#allocation5 + $0x30] sm:$0xff]  ;;  %p680_p0 = scmp.ne.s32.totalorder %s678_s21, %s679_s28  ;;  %p685_p4 = scmp.lt.s32.totalorder %s683_s9, %s679_s28 }
  0x25   : > { %405 = vmatpush.msra.mxu2 %v398_v19  ;;  %v389_v28 = vld [vmem:[#allocation5 + $0x28] sm:$0xff]  ;;  %v388_v29 = vld [vmem:[#allocation5 + $0x20] sm:$0xff]  ;;  %v387_v30 = vld [vmem:[#allocation5 + $0x18] sm:$0xff] }
  0x26   : > { %368 = vmatpush.msra.mxu1 %v353_v7  ;;  %v600_v31 = vld [vmem:[%s903_s2] ss:$0 sm:$0xff]  ;;  %v386_v35 = vld [vmem:[#allocation5 + $0x10] sm:$0xff]  ;;  %v385_v36 = vld [vmem:[#allocation5 + $0x8] sm:$0xff]  ;;  %p681_p1 = pnand %p680_p0, %p817_p5  ;;  %p686_p7 = por %p685_p4, %p684_p3 }
  0x27   : > { %406 = vmatpush.msra.mxu2 %v397_v20  ;;  %v384_v37 = vld [vmem:[#allocation5] sm:$0xff] }
  0x28   : > { %369 = vmatpush.msra.mxu1 %v352_v8  ;;  %v601_v38 = vld [vmem:[%s905_s4] ss:$0 sm:$0xff]  ;;  %p682_p2 = pneg %p681_p1 }
  0x29   : > { %407 = vmatpush.msra.mxu2 %v396_v21  ;;  %v602_v42 = vld [vmem:[%s907_s6] ss:$0 sm:$0xff] }
  0x2a   : > { %370 = vmatpush.msra.mxu1 %v351_v9  ;;  %p687_p8 = pnand %p686_p7, %p682_p2 }
  0x2b   : > { %408 = vmatpush.msra.mxu2 %v395_v22 }
  0x2c   : > { %371 = vmatpush.msra.mxu1 %v350_v10 }
  0x2d   : > { %409 = vmatpush.msra.mxu2 %v394_v23 }
  0x2e   : > { %372 = vmatpush.msra.mxu1 %v349_v11 }
  0x2f   : > { %410 = vmatpush.msra.mxu2 %v393_v24 }
  0x30   : > { %373 = vmatpush.msra.mxu1 %v348_v12 }
  0x31   : > { %411 = vmatpush.msra.mxu2 %v392_v25 }
  0x32   : > { %374 = vmatpush.msra.mxu1 %v347_v13 }
  0x33   : > { %412 = vmatpush.msra.mxu2 %v391_v26 }
  0x34   : > { %375 = vmatpush.msra.mxu1 %v346_v14 }
  0x35   : > { %413 = vmatpush.msra.mxu2 %v390_v27 }
  0x36   : > { %376 = vmatpush.msra.mxu1 %v345_v15 }
  0x37   : > { %414 = vmatpush.msra.mxu2 %v389_v28 }
  0x38   : > { %377 = vmatpush.msra.mxu1 %v344_v16 }
  0x39   : > { %415 = vmatpush.msra.mxu2 %v388_v29 }
  0x3a   : > { %378 = vmatpush.msra.mxu1 %v343_v17 }
  0x3b   : > { %416 = vmatpush.msra.mxu2 %v387_v30 }
  0x3d   : > { %417 = vmatpush.msra.mxu2 %v386_v35 }
  0x3f   : > { %418 = vmatpush.msra.mxu2 %v385_v36 }
  0x41   : > { %419 = vmatpush.msra.mxu2 %v384_v37 }
  0x9f   : > { %v339_v32 = vpop.f32.mrf.mxu0 }
  0xa0   : > { %v340_v33 = vadd.f32 %v600_v31, %v339_v32 }
  0xa2   : > { %v342_v34 = vmax.f32 %v340_v33, 0.0 }
  0xa4   : > { %379 = vmatmul.f32.vlgmr.msra.gmra.mxu1 %v342_v34 }
 0x121   : > { %v380_v39 = vpop.f32.mrf.mxu1 }
 0x122   : > { %v381_v40 = vadd.f32 %v601_v38, %v380_v39 }
 0x124   : > { %v383_v41 = vmax.f32 %v381_v40, 0.0 }
 0x126   : > { %420 = vmatmul.f32.vlgmr.msra.gmra.mxu2 %v383_v41 }
 0x1a9   : > { %v421_v43 = vpop.f32.mrf.mxu2 }
 0x1aa   : > { %v422_v44 = vadd.f32 %v602_v42, %v421_v43 }
 0x1ac   : > { %424 = vst [vmem:[%s303_s17] sm:$0xff] %v422_v44 }
 0x1ad   : > { %690 = shalt.err (!%p687_p8)
}
 0x1ae   : > { %546 = dma.vmem_to_hbm [thread:$0]  (%p817_p5), %s439_s18, 128, %s441_s19, %s426_s20  }
 0x1af PF: > { %p563_p9 = scmp.ge.s32.totalorder %s733_s27, 2  ;;  %s452_s23 = sand.u32 1, %s721_s24  }
 0x1b0   : > { %s453_s13 = scalar_lea.sflag [#allocation4], %s452_s23 }
 0x1b1   : > { %p556_p10 = pnand %p563_p9, %p821_p6 }
 0x1b3   : > { %p557_p11 = pneg %p556_p10 }
 0x1b5   : > { %716 = dma.done.wait (%p557_p11), %s453_s13, 128  }
 0x1b6   : > { %718 = vsyncadd (%p557_p11), %s453_s13, 4294967168  ;;  %p19_p12 = scmp.ge.s32.totalorder %s804_s30, 4   ;;  %s912_s24 = smov %s725_s25 }
 0x1b7   : > { %s913_s25 = smov %s729_s26  ;;  %s914_s26 = smov %s815_s10 }
 0x1b8   : > { %s915_s27 = smov %s804_s30  ;;  %21 = sbr.rel (!%p19_p12) target bundleno = 5 (0x5), region = 92 }
 0x1bd   :  { %459 = vsyncpa [#allocation3], 1 }
 0x1be   :  { %461 = vsyncpa [#allocation3 + $0x1], 1 }
 0x1bf   :  { %462 = vsyncpa [#allocation6], 1 }
 0x1c0   :  { %463 = vsyncpa [#allocation4], 1 }
 0x1c1   :  { %465 = vsyncpa [#allocation4 + $0x1], 1 }

</bundles_post_ra>
